<compile_context>
chip_gen: v7x
topology: tpu7x:2x2x1
jax: 0.10.0
libtpu: 0.0.40
codegen_flags: <defaults>
</compile_context>

<pallas_src>
import math
import numpy as np
import jax
import jax.numpy as jnp
from jax.experimental import pallas as pl
from jax.experimental.pallas import tpu as pltpu

# ---------------- config (small, consistent with the module) ----------------
B = 2           # batch
S = 8           # seq_len
D = 32          # d_model
NH = 4          # nhead
HD = D // NH    # head_dim
FF = 64         # dim_feedforward
BS = B * S      # fused batch*seq rows
EPS = 1e-5
SCALE = 1.0 / math.sqrt(HD)
NEG_INF = -1e30

AUX_ROWS = 8 + NH * BS   # 8 vector-param rows + 64 mask rows


def _layernorm(y, gamma, beta):
    mu = jnp.mean(y, axis=-1, keepdims=True)
    var = jnp.mean((y - mu) * (y - mu), axis=-1, keepdims=True)
    return (y - mu) * jax.lax.rsqrt(var + EPS) * gamma + beta


def encoder_layer_kernel(x_ref, w_ref, aux_ref, o_ref):
    x = x_ref[...]                                   # (BS, D) fused batch*seq rows

    # ---- weight bank: wqkv | wo | wf1 | wf2.T  (static lane slices) ----
    wqkv = w_ref[:, 0:3 * D]                         # (D, 3D), SCALE folded into Q cols
    wo   = w_ref[:, 3 * D:4 * D]                     # (D, D)
    wf1  = w_ref[:, 4 * D:4 * D + FF]                # (D, FF)
    wf2t = w_ref[:, 4 * D + FF:4 * D + 2 * FF]       # (D, FF) == wf2.T

    # ---- aux bank: small vectors (rows 0:8) + precomputed masks (rows 8:) ----
    bqkv = aux_ref[0:1, 0:3 * D]                     # (1, 3D), Q slice pre-scaled
    bo   = aux_ref[1:2, 0:D]
    g1   = aux_ref[2:3, 0:D]
    be1  = aux_ref[3:4, 0:D]
    bf1  = aux_ref[4:5, 0:FF]
    bf2  = aux_ref[5:6, 0:D]
    g2   = aux_ref[6:7, 0:D]
    be2  = aux_ref[7:8, 0:D]
    mask_add = aux_ref[8:8 + NH * BS, 0:BS]          # (NH*BS, BS)  0 / -1e30 additive
    qmask    = aux_ref[8:8 + NH * BS, BS:BS + D]     # (NH*BS, D)   per-head lane mask

    # ---- QKV projection over all B*S rows at once (1 matmul) ----
    qkv = jnp.dot(x, wqkv, preferred_element_type=jnp.float32) + bqkv   # (BS, 3D)
    q = qkv[:, 0 * D:1 * D]
    k = qkv[:, 1 * D:2 * D]
    v = qkv[:, 2 * D:3 * D]

    # ---- head-stacked attention (3 matmuls total) ----
    # Q tiled along sublanes to (NH*BS, D); non-own-head lanes zeroed, so one matmul
    # against K^T yields all per-head score blocks stacked on the sublane axis.
    q_wide = jnp.concatenate([q] * NH, axis=0) * qmask                  # (NH*BS, D)
    s = jnp.dot(q_wide, k.T, preferred_element_type=jnp.float32) + mask_add
    s = s - jnp.max(s, axis=-1, keepdims=True)
    p = jnp.exp(s)
    p = p * pl.reciprocal(jnp.sum(p, axis=-1, keepdims=True), approx=True)

    # One P@V matmul for all heads, then mask + sublane fold back to (BS, D)
    o_wide = jnp.dot(p, v, preferred_element_type=jnp.float32) * qmask  # (NH*BS, D)
    attn = o_wide[0:BS, :]
    for h in range(1, NH):
        attn = attn + o_wide[h * BS:(h + 1) * BS, :]

    # Single output projection (1 matmul)
    attn = jnp.dot(attn, wo, preferred_element_type=jnp.float32) + bo

    # ---- residual + LayerNorm1 (dropout = identity, inference) ----
    y = _layernorm(x + attn, g1, be1)

    # ---- feedforward: Linear -> ReLU -> (Dropout id) -> Linear ----
    h1 = jnp.maximum(jnp.dot(y, wf1, preferred_element_type=jnp.float32) + bf1, 0.0)
    ff = jnp.dot(h1, wf2t.T, preferred_element_type=jnp.float32) + bf2

    # ---- residual + LayerNorm2 ----
    o_ref[...] = _layernorm(y + ff, g2, be2).astype(o_ref.dtype)


def prepare_kernel_inputs(params):
    """One-time host-side packing: weight bank + aux bank (vectors + masks)."""
    (wqkv, bqkv, wo, bo, g1, be1, wf1, bf1, wf2, bf2, g2, be2) = [
        np.asarray(p, dtype=np.float32) for p in params
    ]
    wqkv = wqkv.copy()
    bqkv = bqkv.copy()
    # fold attention scale into the Q projection (weights AND bias)
    wqkv[:, :D] *= SCALE
    bqkv[:D] *= SCALE

    # weight bank (D, 256): wqkv(96) | wo(32) | wf1(64) | wf2.T(64) -> 2x128 lanes, dense
    wbank = np.concatenate([wqkv, wo, wf1, wf2.T], axis=1).astype(np.float32)
    assert wbank.shape == (D, 256)

    # aux bank (72, 128)
    aux = np.zeros((AUX_ROWS, 128), np.float32)
    for row, vec in enumerate((bqkv, bo, g1, be1, bf1, bf2, g2, be2)):
        aux[row, : vec.shape[0]] = vec

    rows = np.arange(NH * BS)
    # additive block-diagonal batch mask (same for every head block)
    qrow_batch = (rows % BS) // S
    col_batch = np.arange(BS) // S
    aux[8:, 0:BS] = np.where(
        qrow_batch[:, None] == col_batch[None, :], 0.0, NEG_INF
    ).astype(np.float32)
    # per-head lane mask: row block h keeps only lanes [h*HD, (h+1)*HD)
    head_of_row = rows // BS
    head_of_lane = np.arange(D) // HD
    aux[8:, BS:BS + D] = (head_of_row[:, None] == head_of_lane[None, :]).astype(np.float32)

    return jnp.asarray(wbank), jnp.asarray(aux)


def xformers_encoder_layer(x, wbank, aux):
    # fuse batch & sequence (free reshape outside the kernel)
    x2d = x.reshape(BS, D)
    vmem = pltpu.MemorySpace.VMEM
    out2d = pl.pallas_call(
        encoder_layer_kernel,
        out_shape=jax.ShapeDtypeStruct((BS, D), x.dtype),
        # gridless single invocation: full arrays resident in VMEM, no pipeline machinery
        in_specs=[
            pl.BlockSpec(memory_space=vmem),   # x (fused rows)
            pl.BlockSpec(memory_space=vmem),   # packed weight bank
            pl.BlockSpec(memory_space=vmem),   # packed vectors + masks
        ],
        out_specs=pl.BlockSpec(memory_space=vmem),
    )(x2d, wbank, aux)
    return out2d.reshape(B, S, D)


def init_params(key):
    ks = jax.random.split(key, 8)
    # Linear weights stored as (in, out); biases / LN params as 1D vectors.
    wqkv = jax.random.normal(ks[0], (D, 3 * D), jnp.float32) * (1.0 / math.sqrt(D))
    bqkv = jax.random.normal(ks[1], (3 * D,), jnp.float32) * 0.01
    wo = jax.random.normal(ks[2], (D, D), jnp.float32) * (1.0 / math.sqrt(D))
    bo = jax.random.normal(ks[3], (D,), jnp.float32) * 0.01
    g1 = jnp.ones((D,), jnp.float32)
    be1 = jnp.zeros((D,), jnp.float32)
    wf1 = jax.random.normal(ks[4], (D, FF), jnp.float32) * (1.0 / math.sqrt(D))
    bf1 = jax.random.normal(ks[5], (FF,), jnp.float32) * 0.01
    wf2 = jax.random.normal(ks[6], (FF, D), jnp.float32) * (1.0 / math.sqrt(FF))
    bf2 = jax.random.normal(ks[7], (D,), jnp.float32) * 0.01
    g2 = jnp.ones((D,), jnp.float32)
    be2 = jnp.zeros((D,), jnp.float32)
    return (wqkv, bqkv, wo, bo, g1, be1, wf1, bf1, wf2, bf2, g2, be2)


def reference_forward(x, params):
    # Pure-JAX reference implementing the same math for a sanity check.
    (wqkv, bqkv, wo, bo, g1, be1, wf1, bf1, wf2, bf2, g2, be2) = params

    def ln(y, g, b):
        mu = jnp.mean(y, axis=-1, keepdims=True)
        var = jnp.mean((y - mu) ** 2, axis=-1, keepdims=True)
        return (y - mu) / jnp.sqrt(var + EPS) * g + b

    qkv = x @ wqkv + bqkv
    q, k, v = jnp.split(qkv, 3, axis=-1)
    q = q.reshape(B, S, NH, HD).transpose(0, 2, 1, 3)
    k = k.reshape(B, S, NH, HD).transpose(0, 2, 1, 3)
    v = v.reshape(B, S, NH, HD).transpose(0, 2, 1, 3)
    s = jnp.einsum("bhqd,bhkd->bhqk", q, k) * SCALE
    p = jax.nn.softmax(s, axis=-1)
    a = jnp.einsum("bhqk,bhkd->bhqd", p, v).transpose(0, 2, 1, 3).reshape(B, S, D)
    a = a @ wo + bo
    y = ln(x + a, g1, be1)
    ff = jnp.maximum(y @ wf1 + bf1, 0.0) @ wf2 + bf2
    return ln(y + ff, g2, be2)


if __name__ == "__main__":
    key = jax.random.PRNGKey(0)
    kx, kp = jax.random.split(key)
    x = jax.random.normal(kx, (B, S, D), jnp.float32)
    params = init_params(kp)

    # one-time host-side packing (weight bank, vector/mask bank)
    wbank, aux = prepare_kernel_inputs(params)

    out = xformers_encoder_layer(x, wbank, aux)
    out = jax.block_until_ready(out)

    ref = reference_forward(x, params)
    assert out.shape == (B, S, D)
    # tolerance accounts for the EUP approximate reciprocal on the softmax denominator
    # (pl.reciprocal(approx=True)); everything else is exact-path f32.
    assert jnp.allclose(out, ref, atol=5e-3, rtol=5e-3), "mismatch vs reference"
    print("KERNEL_OK")
</pallas_src>

<mosaic_0001>
module attributes {stable_mosaic.version = 11 : i64} {
  func.func @encoder_layer_kernel(%arg0: memref<16x32xf32, #tpu.memory_space<vmem>>, %arg1: memref<32x256xf32, #tpu.memory_space<vmem>>, %arg2: memref<72x128xf32, #tpu.memory_space<vmem>>, %arg3: memref<16x32xf32, #tpu.memory_space<vmem>>) attributes {dimension_semantics = [], scalar_prefetch = 0 : i64, scratch_operands = 0 : i64, tpu.core_type = #tpu.core_type<tc>} {
    %c0 = arith.constant 0 : index
    %c0_0 = arith.constant 0 : index
    %0 = vector.load %arg0[%c0, %c0_0] : memref<16x32xf32, #tpu.memory_space<vmem>>, vector<16x32xf32>
    %c0_1 = arith.constant 0 : index
    %c0_2 = arith.constant 0 : index
    %1 = vector.load %arg1[%c0_1, %c0_2] : memref<32x256xf32, #tpu.memory_space<vmem>>, vector<32x96xf32>
    %c0_3 = arith.constant 0 : index
    %c96 = arith.constant 96 : index
    %2 = vector.load %arg1[%c0_3, %c96] : memref<32x256xf32, #tpu.memory_space<vmem>>, vector<32x32xf32>
    %c0_4 = arith.constant 0 : index
    %c128 = arith.constant 128 : index
    %3 = vector.load %arg1[%c0_4, %c128] : memref<32x256xf32, #tpu.memory_space<vmem>>, vector<32x64xf32>
    %c0_5 = arith.constant 0 : index
    %c192 = arith.constant 192 : index
    %4 = vector.load %arg1[%c0_5, %c192] : memref<32x256xf32, #tpu.memory_space<vmem>>, vector<32x64xf32>
    %c0_6 = arith.constant 0 : index
    %c0_7 = arith.constant 0 : index
    %5 = vector.load %arg2[%c0_6, %c0_7] : memref<72x128xf32, #tpu.memory_space<vmem>>, vector<1x96xf32>
    %c1 = arith.constant 1 : index
    %c0_8 = arith.constant 0 : index
    %6 = vector.load %arg2[%c1, %c0_8] : memref<72x128xf32, #tpu.memory_space<vmem>>, vector<1x32xf32>
    %c2 = arith.constant 2 : index
    %c0_9 = arith.constant 0 : index
    %7 = vector.load %arg2[%c2, %c0_9] : memref<72x128xf32, #tpu.memory_space<vmem>>, vector<1x32xf32>
    %c3 = arith.constant 3 : index
    %c0_10 = arith.constant 0 : index
    %8 = vector.load %arg2[%c3, %c0_10] : memref<72x128xf32, #tpu.memory_space<vmem>>, vector<1x32xf32>
    %c4 = arith.constant 4 : index
    %c0_11 = arith.constant 0 : index
    %9 = vector.load %arg2[%c4, %c0_11] : memref<72x128xf32, #tpu.memory_space<vmem>>, vector<1x64xf32>
    %c5 = arith.constant 5 : index
    %c0_12 = arith.constant 0 : index
    %10 = vector.load %arg2[%c5, %c0_12] : memref<72x128xf32, #tpu.memory_space<vmem>>, vector<1x32xf32>
    %c6 = arith.constant 6 : index
    %c0_13 = arith.constant 0 : index
    %11 = vector.load %arg2[%c6, %c0_13] : memref<72x128xf32, #tpu.memory_space<vmem>>, vector<1x32xf32>
    %c7 = arith.constant 7 : index
    %c0_14 = arith.constant 0 : index
    %12 = vector.load %arg2[%c7, %c0_14] : memref<72x128xf32, #tpu.memory_space<vmem>>, vector<1x32xf32>
    %c8 = arith.constant 8 : index
    %c0_15 = arith.constant 0 : index
    %13 = vector.load %arg2[%c8, %c0_15] : memref<72x128xf32, #tpu.memory_space<vmem>>, vector<64x16xf32>
    %c8_16 = arith.constant 8 : index
    %c16 = arith.constant 16 : index
    %14 = vector.load %arg2[%c8_16, %c16] : memref<72x128xf32, #tpu.memory_space<vmem>>, vector<64x32xf32>
    %cst = arith.constant dense<0.000000e+00> : vector<16x96xf32>
    %15 = tpu.matmul %0, %1, %cst {dimension_numbers = #tpu.dot_dimension_numbers<[1], [0], [0], [1], [0, 0, 1, 1], [], []>} : vector<16x32xf32>, vector<32x96xf32>, vector<16x96xf32> -> vector<16x96xf32>
    %16 = vector.broadcast %5 : vector<1x96xf32> to vector<16x96xf32>
    %17 = arith.addf %15, %16 : vector<16x96xf32>
    %18 = vector.extract_strided_slice %17 {offsets = [0, 0], sizes = [16, 32], strides = [1, 1]} : vector<16x96xf32> to vector<16x32xf32>
    %19 = vector.extract_strided_slice %17 {offsets = [0, 32], sizes = [16, 32], strides = [1, 1]} : vector<16x96xf32> to vector<16x32xf32>
    %20 = vector.extract_strided_slice %17 {offsets = [0, 64], sizes = [16, 32], strides = [1, 1]} : vector<16x96xf32> to vector<16x32xf32>
    %21 = tpu.concatenate %18, %18, %18, %18 in 0 : vector<16x32xf32>, vector<16x32xf32>, vector<16x32xf32>, vector<16x32xf32> -> vector<64x32xf32>
    %22 = arith.mulf %21, %14 : vector<64x32xf32>
    %23 = tpu.transpose %19, [1, 0] : vector<16x32xf32> -> vector<32x16xf32>
    %cst_17 = arith.constant dense<0.000000e+00> : vector<64x16xf32>
    %24 = tpu.matmul %22, %23, %cst_17 {dimension_numbers = #tpu.dot_dimension_numbers<[1], [0], [0], [1], [0, 0, 1, 1], [], []>} : vector<64x32xf32>, vector<32x16xf32>, vector<64x16xf32> -> vector<64x16xf32>
    %25 = arith.addf %24, %13 : vector<64x16xf32>
    %cst_18 = arith.constant dense<0xFF800000> : vector<64xf32>
    %26 = vector.multi_reduction <maximumf>, %25, %cst_18 [1] : vector<64x16xf32> to vector<64xf32>
    %27 = vector.shape_cast %26 : vector<64xf32> to vector<64x1xf32>
    %28 = vector.broadcast %27 : vector<64x1xf32> to vector<64x16xf32>
    %29 = arith.subf %25, %28 : vector<64x16xf32>
    %30 = math.exp %29 : vector<64x16xf32>
    %cst_19 = arith.constant dense<0.000000e+00> : vector<64xf32>
    %31 = vector.multi_reduction <add>, %30, %cst_19 [1] : vector<64x16xf32> to vector<64xf32>
    %32 = vector.shape_cast %31 : vector<64xf32> to vector<64x1xf32>
    %33 = tpu.reciprocal %32 {approx = true} : vector<64x1xf32> -> vector<64x1xf32>
    %34 = vector.broadcast %33 : vector<64x1xf32> to vector<64x16xf32>
    %35 = arith.mulf %30, %34 : vector<64x16xf32>
    %cst_20 = arith.constant dense<0.000000e+00> : vector<64x32xf32>
    %36 = tpu.matmul %35, %20, %cst_20 {dimension_numbers = #tpu.dot_dimension_numbers<[1], [0], [0], [1], [0, 0, 1, 1], [], []>} : vector<64x16xf32>, vector<16x32xf32>, vector<64x32xf32> -> vector<64x32xf32>
    %37 = arith.mulf %36, %14 : vector<64x32xf32>
    %38 = vector.extract_strided_slice %37 {offsets = [0, 0], sizes = [16, 32], strides = [1, 1]} : vector<64x32xf32> to vector<16x32xf32>
    %39 = vector.extract_strided_slice %37 {offsets = [16, 0], sizes = [16, 32], strides = [1, 1]} : vector<64x32xf32> to vector<16x32xf32>
    %40 = arith.addf %38, %39 : vector<16x32xf32>
    %41 = vector.extract_strided_slice %37 {offsets = [32, 0], sizes = [16, 32], strides = [1, 1]} : vector<64x32xf32> to vector<16x32xf32>
    %42 = arith.addf %40, %41 : vector<16x32xf32>
    %43 = vector.extract_strided_slice %37 {offsets = [48, 0], sizes = [16, 32], strides = [1, 1]} : vector<64x32xf32> to vector<16x32xf32>
    %44 = arith.addf %42, %43 : vector<16x32xf32>
    %cst_21 = arith.constant dense<0.000000e+00> : vector<16x32xf32>
    %45 = tpu.matmul %44, %2, %cst_21 {dimension_numbers = #tpu.dot_dimension_numbers<[1], [0], [0], [1], [0, 0, 1, 1], [], []>} : vector<16x32xf32>, vector<32x32xf32>, vector<16x32xf32> -> vector<16x32xf32>
    %46 = vector.broadcast %6 : vector<1x32xf32> to vector<16x32xf32>
    %47 = arith.addf %45, %46 : vector<16x32xf32>
    %48 = arith.addf %0, %47 : vector<16x32xf32>
    %cst_22 = arith.constant dense<0.000000e+00> : vector<16xf32>
    %49 = vector.multi_reduction <add>, %48, %cst_22 [1] : vector<16x32xf32> to vector<16xf32>
    %50 = vector.shape_cast %49 : vector<16xf32> to vector<16x1xf32>
    %cst_23 = arith.constant 3.200000e+01 : f32
    %51 = vector.broadcast %cst_23 : f32 to vector<16x1xf32>
    %52 = arith.divf %50, %51 : vector<16x1xf32>
    %53 = vector.broadcast %52 : vector<16x1xf32> to vector<16x32xf32>
    %54 = arith.subf %48, %53 : vector<16x32xf32>
    %55 = vector.broadcast %52 : vector<16x1xf32> to vector<16x32xf32>
    %56 = arith.subf %48, %55 : vector<16x32xf32>
    %57 = arith.mulf %54, %56 : vector<16x32xf32>
    %cst_24 = arith.constant dense<0.000000e+00> : vector<16xf32>
    %58 = vector.multi_reduction <add>, %57, %cst_24 [1] : vector<16x32xf32> to vector<16xf32>
    %59 = vector.shape_cast %58 : vector<16xf32> to vector<16x1xf32>
    %cst_25 = arith.constant 3.200000e+01 : f32
    %60 = vector.broadcast %cst_25 : f32 to vector<16x1xf32>
    %61 = arith.divf %59, %60 : vector<16x1xf32>
    %62 = vector.broadcast %52 : vector<16x1xf32> to vector<16x32xf32>
    %63 = arith.subf %48, %62 : vector<16x32xf32>
    %cst_26 = arith.constant 9.99999974E-6 : f32
    %64 = vector.broadcast %cst_26 : f32 to vector<16x1xf32>
    %65 = arith.addf %61, %64 : vector<16x1xf32>
    %66 = math.rsqrt %65 : vector<16x1xf32>
    %67 = vector.broadcast %66 : vector<16x1xf32> to vector<16x32xf32>
    %68 = arith.mulf %63, %67 : vector<16x32xf32>
    %69 = vector.broadcast %7 : vector<1x32xf32> to vector<16x32xf32>
    %70 = arith.mulf %68, %69 : vector<16x32xf32>
    %71 = vector.broadcast %8 : vector<1x32xf32> to vector<16x32xf32>
    %72 = arith.addf %70, %71 : vector<16x32xf32>
    %cst_27 = arith.constant dense<0.000000e+00> : vector<16x64xf32>
    %73 = tpu.matmul %72, %3, %cst_27 {dimension_numbers = #tpu.dot_dimension_numbers<[1], [0], [0], [1], [0, 0, 1, 1], [], []>} : vector<16x32xf32>, vector<32x64xf32>, vector<16x64xf32> -> vector<16x64xf32>
    %74 = vector.broadcast %9 : vector<1x64xf32> to vector<16x64xf32>
    %75 = arith.addf %73, %74 : vector<16x64xf32>
    %cst_28 = arith.constant 0.000000e+00 : f32
    %76 = vector.broadcast %cst_28 : f32 to vector<16x64xf32>
    %77 = arith.maximumf %75, %76 : vector<16x64xf32>
    %78 = tpu.transpose %4, [1, 0] : vector<32x64xf32> -> vector<64x32xf32>
    %cst_29 = arith.constant dense<0.000000e+00> : vector<16x32xf32>
    %79 = tpu.matmul %77, %78, %cst_29 {dimension_numbers = #tpu.dot_dimension_numbers<[1], [0], [0], [1], [0, 0, 1, 1], [], []>} : vector<16x64xf32>, vector<64x32xf32>, vector<16x32xf32> -> vector<16x32xf32>
    %80 = vector.broadcast %10 : vector<1x32xf32> to vector<16x32xf32>
    %81 = arith.addf %79, %80 : vector<16x32xf32>
    %82 = arith.addf %72, %81 : vector<16x32xf32>
    %cst_30 = arith.constant dense<0.000000e+00> : vector<16xf32>
    %83 = vector.multi_reduction <add>, %82, %cst_30 [1] : vector<16x32xf32> to vector<16xf32>
    %84 = vector.shape_cast %83 : vector<16xf32> to vector<16x1xf32>
    %cst_31 = arith.constant 3.200000e+01 : f32
    %85 = vector.broadcast %cst_31 : f32 to vector<16x1xf32>
    %86 = arith.divf %84, %85 : vector<16x1xf32>
    %87 = vector.broadcast %86 : vector<16x1xf32> to vector<16x32xf32>
    %88 = arith.subf %82, %87 : vector<16x32xf32>
    %89 = vector.broadcast %86 : vector<16x1xf32> to vector<16x32xf32>
    %90 = arith.subf %82, %89 : vector<16x32xf32>
    %91 = arith.mulf %88, %90 : vector<16x32xf32>
    %cst_32 = arith.constant dense<0.000000e+00> : vector<16xf32>
    %92 = vector.multi_reduction <add>, %91, %cst_32 [1] : vector<16x32xf32> to vector<16xf32>
    %93 = vector.shape_cast %92 : vector<16xf32> to vector<16x1xf32>
    %cst_33 = arith.constant 3.200000e+01 : f32
    %94 = vector.broadcast %cst_33 : f32 to vector<16x1xf32>
    %95 = arith.divf %93, %94 : vector<16x1xf32>
    %96 = vector.broadcast %86 : vector<16x1xf32> to vector<16x32xf32>
    %97 = arith.subf %82, %96 : vector<16x32xf32>
    %cst_34 = arith.constant 9.99999974E-6 : f32
    %98 = vector.broadcast %cst_34 : f32 to vector<16x1xf32>
    %99 = arith.addf %95, %98 : vector<16x1xf32>
    %100 = math.rsqrt %99 : vector<16x1xf32>
    %101 = vector.broadcast %100 : vector<16x1xf32> to vector<16x32xf32>
    %102 = arith.mulf %97, %101 : vector<16x32xf32>
    %103 = vector.broadcast %11 : vector<1x32xf32> to vector<16x32xf32>
    %104 = arith.mulf %102, %103 : vector<16x32xf32>
    %105 = vector.broadcast %12 : vector<1x32xf32> to vector<16x32xf32>
    %106 = arith.addf %104, %105 : vector<16x32xf32>
    %c0_35 = arith.constant 0 : index
    %c0_36 = arith.constant 0 : index
    %107 = vector.load %arg3[%c0_35, %c0_36] : memref<16x32xf32, #tpu.memory_space<vmem>>, vector<16x32xf32>
    tpu.vector_store %arg3[%c0_35, %c0_36], %106 {strides = array<i32>} : memref<16x32xf32, #tpu.memory_space<vmem>>, vector<16x32xf32>,
    return
  }
}

</mosaic_0001>

<bundles_post_ra>
// kernel: tpu_custom_call.1
= control target key start
LH: loop header
LB: loop body
LE: loop exit
PB: predicated region body
PF: predicated region fallthrough
CT: control target
= control target key end

     0   :  { %8 = vsyncpa [#allocation3], 0  ;;  %s1610_s0 = inlined_call_operand.hbm [shape: f32[16,32], index: 0, kind: input, shape index: {}]   ;;  %s1611_s1 = inlined_call_operand.hbm [shape: f32[32,256], index: 1, kind: input, shape index: {}]   ;;  %s1612_s2 = inlined_call_operand.hbm [shape: f32[72,128], index: 2, kind: input, shape index: {}]   ;;  %s1613_s3 = inlined_call_operand.hbm [shape: f32[16,32], index: 3, kind: output, shape index: {}]  }
   0x1   :  { %9 = vsyncpa [#allocation6], 0 }
   0x2   :  { %10 = vsyncpa [#allocation4], 0  ;;  %s1362_s12 = smov [#allocation5]   ;;  %s1268_s16 = scalar_lea.hbm %s1611_s1, 1024 }
   0x3   :  { %s28_s13 = sshll.u32 %s1362_s12, 4  ;;  %p1269_p0 = scmp.ne.s32.totalorder %s1611_s1, %s1268_s16  ;;  %s29_s13 = int_to_ptr.vmem [resolvable:$true] %s28_s13 }
   0x4   :  { %p1272_p1 = scmp.lt.u32.totalorder %s1268_s16, %s1611_s1 }
   0x6   :  { %p1274_p2 = pnand %p1272_p1, %p1269_p0 }
   0x8   :  { %1277 = shalt.err (!%p1274_p2)
}
   0x9   :  { %s1278_s21 = scalar_lea.vmem %s29_s13, 1024  ;;  %p1283_p4 = scmp.lt.s32.totalorder %s29_s13, %s29_s13 }
   0xa   :  { %p1279_p3 = scmp.ne.s32.totalorder %s29_s13, %s1278_s21  ;;  %p1284_p5 = scmp.lt.s32.totalorder %s1278_s21, %s1278_s21 }
   0xc   :  { %p1285_p6 = por %p1284_p5, %p1283_p4 }
   0xe   :  { %p1286_p7 = pnand %p1285_p6, %p1279_p3 }
  0x10   :  { %1289 = shalt.err (!%p1286_p7)
}
  0x11   :  { %s1363_s22 = smov 256   ;;  %s1364_s23 = smov 16  }
  0x12   :  { %34 = dma.hbm_to_vmem [thread:$0]  %s1611_s1, 1024, %s29_s13, [#allocation6], %s1363_s22, %s1363_s22, %s1364_s23  }
  0x13   :  { %s1365_s26 = smov [#allocation2]   ;;  %s1290_s30 = scalar_lea.hbm %s1610_s0, 256 }
  0x14   :  { %s16_s27 = sshll.u32 %s1365_s26, 4  ;;  %p1291_p8 = scmp.ne.s32.totalorder %s1610_s0, %s1290_s30  ;;  %s17_s27 = int_to_ptr.vmem [resolvable:$true] %s16_s27 }
  0x15   :  { %p1294_p9 = scmp.lt.u32.totalorder %s1290_s30, %s1610_s0 }
  0x17   :  { %p1296_p10 = pnand %p1294_p9, %p1291_p8 }
  0x19   :  { %1299 = shalt.err (!%p1296_p10)
}
  0x1a   :  { %s1300_s8 = scalar_lea.vmem %s17_s27, 256  ;;  %p1305_p12 = scmp.lt.s32.totalorder %s17_s27, %s17_s27 }
  0x1b   :  { %p1301_p11 = scmp.ne.s32.totalorder %s17_s27, %s1300_s8  ;;  %p1306_p13 = scmp.lt.s32.totalorder %s1300_s8, %s1300_s8 }
  0x1d   :  { %p1307_p0 = por %p1306_p13, %p1305_p12 }
  0x1f   :  { %p1308_p1 = pnand %p1307_p0, %p1301_p11 }
  0x21   :  { %1311 = shalt.err (!%p1308_p1)
}
  0x22   :  { %s1366_s1 = smov 128   ;;  %s1367_s9 = smov 8  }
  0x23   :  { %22 = dma.hbm_to_vmem [thread:$0]  %s1610_s0, 256, %s17_s27, [#allocation3], %s1366_s1, %s1366_s1, %s1367_s9  }
  0x24   :  { %s1368_s12 = smov [#allocation7]   ;;  %s1312_s16 = scalar_lea.hbm %s1612_s2, 1152 }
  0x25   :  { %s40_s13 = sshll.u32 %s1368_s12, 4  ;;  %p1313_p2 = scmp.ne.s32.totalorder %s1612_s2, %s1312_s16  ;;  %s41_s13 = int_to_ptr.vmem [resolvable:$true] %s40_s13 }
  0x26   :  { %p1316_p3 = scmp.lt.u32.totalorder %s1312_s16, %s1612_s2 }
  0x28   :  { %p1318_p4 = pnand %p1316_p3, %p1313_p2 }
  0x2a   :  { %1321 = shalt.err (!%p1318_p4)
}
  0x2b   :  { %s1322_s21 = scalar_lea.vmem %s41_s13, 1152  ;;  %p1327_p6 = scmp.lt.s32.totalorder %s41_s13, %s41_s13 }
  0x2c   :  { %p1323_p5 = scmp.ne.s32.totalorder %s41_s13, %s1322_s21  ;;  %p1328_p7 = scmp.lt.s32.totalorder %s1322_s21, %s1322_s21 }
  0x2e   :  { %p1329_p8 = por %p1328_p7, %p1327_p6 }
  0x30   :  { %p1330_p9 = pnand %p1329_p8, %p1323_p5 }
  0x32   :  { %1333 = shalt.err (!%p1330_p9)
}
  0x33   :  { %46 = dma.hbm_to_vmem [thread:$0]  %s1612_s2, 1152, %s41_s13, [#allocation6], %s1366_s1, %s1366_s1, %s1367_s9  }
  0x34   :  { %1356 = dma.done.wait [#allocation3], 256  }
  0x35   :  { %1357 = vsyncadd [#allocation3], 4294967040 }
  0x36   :  { %1358 = dma.done.wait [#allocation6], 2176  }
  0x37   :  { %1359 = vsyncadd [#allocation6], 4294965120  ;;  %vm86_vm0 = vcmask 261120   ;;  %v1436_v0 = vld [vmem:[#allocation5] sm:$0xff]  ;;  %v1438_v1 = vld [vmem:[#allocation5 + $0x10] sm:$0xff]  ;;  %s1369_s2 = smov 112  }
  0x38   :  { %v1440_v2 = vld [vmem:[#allocation5 + $0x20] sm:$0xff]  ;;  %v1208_v3 = vpack.i.bf16 %v1438_v1, %v1436_v0  ;;  %v1138_v4 = vpack.c.bf16 %v1438_v1, %v1436_v0  ;;  %v1446_v5 = vld [vmem:[#allocation5 + $0x30] sm:$0xff]  ;;  %v1454_v8 = vld [vmem:[#allocation7 + $0x8] sm:$0xff]  ;;  %s1370_s23 = smov 96   ;;  %vm347_vm2 = vcmask 130048   ;;  %s1371_s24 = smov 64  }
  0x39   :  { %v1448_v6 = vld [vmem:[#allocation2] sm:$0xff]  ;;  %v1142_v7 = vpack.c.bf16 %v1446_v5, %v1440_v2  ;;  %176 = vrot.lane.b32.xlu1 %v1454_v8, %s1369_s2  ;;  %v1458_v9 = vld [vmem:[#allocation7 + $0x20] sm:$0xff]  ;;  %v1462_v10 = vld [vmem:[#allocation2 + $0x8] sm:$0xff]  ;;  %s1372_s25 = smov 32   ;;  %vm830_vm3 = vcmask 523264   ;;  %s1373_s26 = smov [#allocation8]  }
  0x3a   :  { %1070 = vmatprep.mubr.msk.f32.mxu0 %vm86_vm0, %v1448_v6  ;;  %1139 = vmatprep.subr.bf16.mxu0 %v1138_v4  ;;  %v1464_v11 = vld [vmem:[#allocation7 + $0x30] sm:$0xff]  ;;  %v1470_v12 = vld [vmem:[#allocation7 + $0x40] sm:$0xff]  ;;  %v76_v22 = vld [vmem:[#allocation7 + $0x18] sm:$0xff]  ;;  %s967_s27 = sshll.u32 %s1373_s26, 4  ;;  %s968_s27 = int_to_ptr.vmem [resolvable:$true] %s967_s27 }
  0x3b   :  { %1141 = vmatpush3.bf16.msra.mxu0 %v1138_v4  ;;  %v980_v13 = vld [vmem:[#allocation7] ss:$0 sm:$0xff]  ;;  %v75_v21 = vld [vmem:[#allocation7 + $0x10] sm:$0xff]  ;;  %v78_v23 = vld [vmem:[#allocation7 + $0x28] sm:$0xff]  ;;  %s1334_s28 = scalar_lea.vmem %s968_s27, 256  ;;  %p1339_p11 = scmp.lt.s32.totalorder %s968_s27, %s968_s27 }
  0x3c   :  { %1143 = vmatprep.subr.bf16.mxu0 %v1142_v7  ;;  %vm1147_vm1 = vmpackc.low %vm86_vm0, %vm86_vm0  ;;  %v1519_v52 = vld [vmem:[#allocation7 + $0x38] sm:$0xff]  ;;  %p1335_p10 = scmp.ne.s32.totalorder %s968_s27, %s1334_s28  ;;  %p1340_p12 = scmp.lt.s32.totalorder %s1334_s28, %s1334_s28 }
  0x3d   :  { %182 = vrot.lane.b32.xlu1 %v1458_v9, %s1369_s2  ;;  %vm1173_vm4 = vmpackc.low %vm830_vm3, %vm830_vm3 }
  0x3e   :  { %p1341_p13 = por %p1340_p12, %p1339_p11 }
  0x3f   :  { %1145 = vmatpush3.bf16.msra.mxu0 %v1142_v7 }
  0x40   :  { %p1342_p0 = pnand %p1341_p13, %p1335_p10 }
  0x41   :  { %186 = vrot.lane.b32.xlu1 %v1464_v11, %s1369_s2 }
  0x42   :  { %1071 = vmatmul.mubr.msk.f32.vlgmr.msra.gmra.mrb[0].mxu0 %vm86_vm0, %v1462_v10 }
  0x45   :  { %190 = vrot.lane.b32.xlu1 %v1470_v12, %s1369_s2 }
  0xab   :  { %v1476_v18 = vpop.permute.xlu1 %176 }
  0xaf   :  { %v1490_v28 = vpop.permute.xlu1 %182 }
  0xb3   :  { %v1496_v31 = vpop.permute.xlu1 %186 }
  0xb7   :  { %v1508_v37 = vpop.permute.xlu1 %190 }
 0x115   :  { %v1072_v14 = vpop.f32.mrb[0].mxu0 }
 0x116   :  { %v165_v15 = vadd.f32 %v1072_v14, %v980_v13  ;;  %v159_v16 = vpop.f32.mrb[1].mxu0 }
 0x117   :  { %v1474_v17 = vadd.f32 %v980_v13, %v159_v16 }
 0x118   :  { %v203_v33 = vmul.f32 %v1490_v28, %v165_v15  ;;  %v205_v36 = vmul.f32 %v1496_v31, %v165_v15  ;;  %v207_v39 = vmul.f32 %v1508_v37, %v165_v15 }
 0x119   :  { %v1479_v19 = vpack.i.bf16 %v165_v15, %v1474_v17  ;;  %v200_v20 = vmul.f32 %v1476_v18, %v1474_v17 }
 0x11b   :  { %1199 = vrot.lane.b32.xlu0 %v1479_v19, %s1370_s23  ;;  %1077 = vmatprep.mubr.msk.f32.mxu1 %vm86_vm0, %v200_v20 }
 0x11f   :  { %178 = vrot.lane.b32.xlu0 %v75_v21, %s1369_s2 }
 0x123   :  { %180 = vrot.lane.b32.xlu0 %v76_v22, %s1369_s2 }
 0x127   :  { %184 = vrot.lane.b32.xlu0 %v78_v23, %s1369_s2 }
 0x18d   :  { %v1200_v24 = vpop.permute.xlu0 %1199 }
 0x18e   :  { %v1202_v25 = vunpack.i.h.bf16 %v1200_v24  ;;  %v1201_v26 = vunpack.i.l.bf16 %v1200_v24 }
 0x190   :  { %v1146_v27 = vpack.c.bf16 %v1202_v25, %v1201_v26 }
 0x191   :  { %v1492_v29 = vpop.permute.xlu0 %178 }
 0x192   :  { %1148 = vmatprep.subr.msk.bf16.mxu0 %vm1147_vm1, %v1146_v27  ;;  %1184 = vmatprep.subr.msk.bf16.mxu1 %vm1147_vm1, %v1146_v27  ;;  %v201_v32 = vmul.f32 %v1492_v29, %v165_v15 }
 0x193   :  { %1151 = vmatpush3.bf16.xpose.msk.msra.mxu0 %vm1147_vm1, %v1146_v27  ;;  %1185 = vmatpush3.bf16.xpose.msk.msra.mxu1 %vm1147_vm1, %v1146_v27 }
 0x195   :  { %v1494_v30 = vpop.permute.xlu0 %180 }
 0x196   :  { %v202_v34 = vmul.f32 %v1494_v30, %v1474_v17 }
 0x199   :  { %v1502_v35 = vpop.permute.xlu0 %184 }
 0x19a   :  { %1078 = vmatmul.mubr.msk.f32.vlgmr.msra.gmra.mrb[2].mxu0 %vm86_vm0, %v201_v32  ;;  %1081 = vmatmul.mubr.msk.f32.vlgmr.msra.gmra.mrb[0].mxu1 %vm86_vm0, %v203_v33  ;;  %v204_v38 = vmul.f32 %v1502_v35, %v1474_v17 }
 0x19b   :  { %1080 = vmatprep.mubr.msk.f32.mxu1 %vm86_vm0, %v202_v34 }
 0x19e   :  { %1084 = vmatmul.mubr.msk.f32.gmra.mrb[2].mxu1 %vm86_vm0, %v205_v36 }
 0x19f   :  { %1083 = vmatprep.mubr.msk.f32.mxu1 %vm86_vm0, %v204_v38 }
 0x1a2   :  { %1087 = vmatmul.mubr.msk.f32.gmra.mrb[4].mxu1 %vm86_vm0, %v207_v39 }
 0x26d   :  { %v1079_v40 = vpop.f32.mrb[2].mxu0  ;;  %v1082_v41 = vpop.f32.mrb[0].mxu1 }
 0x26e   :  { %v314_v42 = vadd.f32 %v1079_v40, %v75_v21  ;;  %v308_v43 = vpop.f32.mrb[3].mxu0  ;;  %v318_v44 = vpop.f32.mrb[1].mxu1  ;;  %v324_v53 = vadd.f32 %v1082_v41, %v1458_v9 }
 0x26f   :  { %v309_v45 = vadd.f32 %v308_v43, %v1454_v8  ;;  %v319_v47 = vadd.f32 %v318_v44, %v76_v22 }
 0x270   :  { %v351_v46 = vsel %vm347_vm2, %v314_v42, -inf  ;;  %v357_v61 = vsel %vm347_vm2, %v324_v53, -inf }
 0x271   :  { %352 = vmax.xlane.f32.xlu1 %v351_v46  ;;  %v1085_v48 = vpop.f32.mrb[2].mxu1  ;;  %v348_v49 = vsel %vm347_vm2, %v309_v45, -inf  ;;  %v354_v56 = vsel %vm347_vm2, %v319_v47, -inf }
 0x272   :  { %349 = vmax.xlane.f32.xlu0 %v348_v49  ;;  %v328_v50 = vpop.f32.mrb[3].mxu1  ;;  %v334_v59 = vadd.f32 %v1085_v48, %v1464_v11 }
 0x273   :  { %v329_v51 = vadd.f32 %v328_v50, %v78_v23 }
 0x274   :  { %v363_v63 = vsel %vm347_vm2, %v334_v59, -inf }
 0x275   :  { %v1088_v54 = vpop.f32.mrb[4].mxu1  ;;  %v360_v55 = vsel %vm347_vm2, %v329_v51, -inf }
 0x276   :  { %v338_v57 = vpop.f32.mrb[5].mxu1  ;;  %361 = vmax.xlane.f32.xlu1 %v360_v55  ;;  %355 = vmax.xlane.f32.xlu0 %v354_v56  ;;  %v344_v62 = vadd.f32 %v1088_v54, %v1470_v12 }
 0x277   :  { %v339_v58 = vadd.f32 %v338_v57, %v1519_v52 }
 0x278   :  { %v369_v4 = vsel %vm347_vm2, %v344_v62, -inf }
 0x279   :  { %v366_v60 = vsel %vm347_vm2, %v339_v58, -inf }
 0x27a   :  { %367 = vmax.xlane.f32.xlu1 %v366_v60  ;;  %358 = vmax.xlane.f32.xlu0 %v357_v61 }
 0x27e   :  { %364 = vmax.xlane.f32.xlu0 %v363_v63 }
 0x282   :  { %370 = vmax.xlane.f32.xlu0 %v369_v4 }
 0x2fe   :  { %v353_v7 = vpop.xlane.xlu1 %352 }
 0x2ff   :  { %v373_v8 = vsub.f32 %v314_v42, %v353_v7  ;;  %v350_v9 = vpop.xlane.xlu0 %349 }
 0x300   :  { %v372_v13 = vsub.f32 %v309_v45, %v350_v9 }
 0x301   :  { %v382_v14 = vmul.f32 1.442695, %v373_v8 }
 0x302   :  { %v380_v11 = vmul.f32 1.442695, %v372_v13 }
 0x303   :  { %1228 = vpow2.f32 %v382_v14  ;;  %v362_v15 = vpop.xlane.xlu1 %361  ;;  %v356_v16 = vpop.xlane.xlu0 %355 }
 0x304   :  { %1230 = vpow2.f32 %v380_v11  ;;  %v376_v20 = vsub.f32 %v329_v51, %v362_v15  ;;  %v374_v21 = vsub.f32 %v319_v47, %v356_v16 }
 0x306   :  { %v384_v22 = vmul.f32 1.442695, %v374_v21  ;;  %v388_v12 = vmul.f32 1.442695, %v376_v20 }
 0x307   :  { %v368_v23 = vpop.xlane.xlu1 %367  ;;  %v359_v24 = vpop.xlane.xlu0 %358 }
 0x308   :  { %v378_v25 = vsub.f32 %v339_v58, %v368_v23  ;;  %v375_v26 = vsub.f32 %v324_v53, %v359_v24  ;;  %1232 = vpow2.f32 %v384_v22  ;;  %v1213_v58 = vpack.i.bf16 %v1446_v5, %v1440_v2 }
 0x309   :  { %1234 = vpow2.f32 %v388_v12 }
 0x30a   :  { %v386_v27 = vmul.f32 1.442695, %v375_v26  ;;  %v392_v32 = vmul.f32 1.442695, %v378_v25 }
 0x30b   :  { %v365_v33 = vpop.xlane.xlu0 %364 }
 0x30c   :  { %v377_v34 = vsub.f32 %v334_v59, %v365_v33  ;;  %1236 = vpow2.f32 %v386_v27 }
 0x30d   :  { %v1531_v36 = vpop.eup %1228  ;;  %1238 = vpow2.f32 %v392_v32 }
 0x30e   :  { %v1533_v38 = vpop.eup %1230  ;;  %v390_v39 = vmul.f32 1.442695, %v377_v34  ;;  %v399_v40 = vsel %vm347_vm2, %v1531_v36, 0.0 }
 0x30f   :  { %400 = vadd.xlane.f32.xlu0 %v399_v40  ;;  %v371_v41 = vpop.xlane.xlu0 %370  ;;  %v396_v42 = vsel %vm347_vm2, %v1533_v38, 0.0 }
 0x310   :  { %1240 = vpow2.f32 %v390_v39  ;;  %v379_v43 = vsub.f32 %v344_v62, %v371_v41  ;;  %397 = vadd.xlane.f32.xlu1 %v396_v42 }
 0x312   :  { %v394_v44 = vmul.f32 1.442695, %v379_v43  ;;  %v1233_v45 = vpop.eup %1232 }
 0x313   :  { %v402_v46 = vsel %vm347_vm2, %v1233_v45, 0.0  ;;  %v1235_v47 = vpop.eup %1234 }
 0x314   :  { %1242 = vpow2.f32 %v394_v44  ;;  %403 = vadd.xlane.f32.xlu1 %v402_v46  ;;  %v408_v49 = vsel %vm347_vm2, %v1235_v47, 0.0 }
 0x316   :  { %v1237_v48 = vpop.eup %1236 }
 0x317   :  { %v405_v50 = vsel %vm347_vm2, %v1237_v48, 0.0  ;;  %v1239_v51 = vpop.eup %1238 }
 0x318   :  { %409 = vadd.xlane.f32.xlu1 %v408_v49  ;;  %406 = vadd.xlane.f32.xlu0 %v405_v50  ;;  %v414_v55 = vsel %vm347_vm2, %v1239_v51, 0.0 }
 0x31a   :  { %v1241_v53 = vpop.eup %1240 }
 0x31b   :  { %v411_v54 = vsel %vm347_vm2, %v1241_v53, 0.0 }
 0x31c   :  { %415 = vadd.xlane.f32.xlu1 %v414_v55  ;;  %412 = vadd.xlane.f32.xlu0 %v411_v54 }
 0x31e   :  { %v1243_v56 = vpop.eup %1242 }
 0x31f   :  { %v417_v57 = vsel %vm347_vm2, %v1243_v56, 0.0 }
 0x320   :  { %418 = vadd.xlane.f32.xlu0 %v417_v57 }
 0x32d   :  { %1204 = vrot.lane.b32.xlu1 %v1479_v19, %s1371_s24 }
 0x331   :  { %1209 = vrot.lane.b32.xlu1 %v1208_v3, %s1372_s25 }
 0x335   :  { %1214 = vrot.lane.b32.xlu1 %v1213_v58, %s1372_s25 }
 0x336   :  { %188 = vrot.lane.b32.xlu0 %v1519_v52, %s1369_s2 }
 0x39c   :  { %v401_v60 = vpop.xlane.xlu0 %400 }
 0x39d   :  { %v398_v59 = vpop.xlane.xlu1 %397 }
 0x39e   :  { %1244 = vrcp.f32 %v398_v59 }
 0x39f   :  { %1246 = vrcp.f32 %v401_v60 }
 0x3a1   :  { %v404_v61 = vpop.xlane.xlu1 %403 }
 0x3a2   :  { %1248 = vrcp.f32 %v404_v61 }
 0x3a5   :  { %v410_v62 = vpop.xlane.xlu1 %409  ;;  %v407_v63 = vpop.xlane.xlu0 %406 }
 0x3a6   :  { %1250 = vrcp.f32 %v407_v63 }
 0x3a7   :  { %1252 = vrcp.f32 %v410_v62 }
 0x3a8   :  { %v1245_v3 = vpop.eup %1244 }
 0x3a9   :  { %v416_v19 = vpop.xlane.xlu1 %415  ;;  %v413_v4 = vpop.xlane.xlu0 %412  ;;  %v428_v14 = vmul.f32 %v1245_v3, %v1533_v38 }
 0x3aa   :  { %1254 = vrcp.f32 %v413_v4  ;;  %v1247_v5 = vpop.eup %1246 }
 0x3ab   :  { %1256 = vrcp.f32 %v416_v19  ;;  %v429_v11 = vmul.f32 %v1247_v5, %v1531_v36 }
 0x3ac   :  { %v1249_v9 = vpop.eup %1248 }
 0x3ad   :  { %v1205_v52 = vpop.permute.xlu1 %1204  ;;  %v419_v7 = vpop.xlane.xlu0 %418  ;;  %v430_v16 = vmul.f32 %v1249_v9, %v1233_v45 }
 0x3ae   :  { %v1207_v0 = vunpack.i.h.bf16 %v1205_v52  ;;  %v1206_v1 = vunpack.i.l.bf16 %v1205_v52  ;;  %1258 = vrcp.f32 %v419_v7 }
 0x3b0   :  { %v1152_v2 = vpack.c.bf16 %v1207_v0, %v1206_v1  ;;  %v1251_v15 = vpop.eup %1250 }
 0x3b1   :  { %v189_v8 = vpop.permute.xlu0 %188  ;;  %v1253_v20 = vpop.eup %1252  ;;  %v431_v21 = vmul.f32 %v1251_v15, %v1237_v48  ;;  %v65_v15 = vld [vmem:[#allocation5 + $0x38] sm:$0xff] }
 0x3b2   :  { %v206_v13 = vmul.f32 %v189_v8, %v1474_v17  ;;  %1153 = vmatprep.subr.bf16.mxu0 %v1152_v2  ;;  %v432_v22 = vmul.f32 %v1253_v20, %v1235_v47  ;;  %v1210_v27 = vpop.permute.xlu1 %1209 }
 0x3b3   :  { %1155 = vmatpush3.bf16.msra.mxu0 %v1152_v2  ;;  %v1212_v32 = vunpack.i.h.bf16 %v1210_v27  ;;  %v1211_v33 = vunpack.i.l.bf16 %v1210_v27 }
 0x3b4   :  { %1086 = vmatprep.mubr.msk.f32.mxu0 %vm86_vm0, %v206_v13  ;;  %v1255_v17 = vpop.eup %1254  ;;  %v63_v13 = vld [vmem:[#allocation5 + $0x18] sm:$0xff] }
 0x3b5   :  { %1093 = vmatprep.mubr.msk.f32.mxu0 %vm347_vm2, %v428_v14  ;;  %v1257_v12 = vpop.eup %1256  ;;  %v433_v23 = vmul.f32 %v1255_v17, %v1241_v53  ;;  %v1156_v34 = vpack.c.bf16 %v1212_v32, %v1211_v33  ;;  %v1004_v33 = vld [vmem:[#allocation7 + $0x2] ss:$0 sm:$0xff] }
 0x3b6   :  { %1094 = vmatmul.mubr.msk.f32.vlgmr.msra.gmra.mrb[4].mxu0 %vm347_vm2, %v429_v11  ;;  %v434_v25 = vmul.f32 %v1257_v12, %v1239_v51  ;;  %v1215_v36 = vpop.permute.xlu1 %1214  ;;  %v64_v11 = vld [vmem:[#allocation5 + $0x28] sm:$0xff] }
 0x3b7   :  { %1096 = vmatprep.mubr.msk.f32.mxu0 %vm347_vm2, %v430_v16  ;;  %1157 = vmatprep.subr.bf16.mxu1 %v1156_v34  ;;  %v1217_v38 = vunpack.i.h.bf16 %v1215_v36  ;;  %v1216_v39 = vunpack.i.l.bf16 %v1215_v36  ;;  %v1168_v16 = vpack.c.bf16 %v65_v15, %v64_v11 }
 0x3b8   :  { %v1259_v24 = vpop.eup %1258  ;;  %1159 = vmatpush3.bf16.msra.mxu1 %v1156_v34 }
 0x3b9   :  { %v435_v26 = vmul.f32 %v1259_v24, %v1243_v56  ;;  %v1160_v40 = vpack.c.bf16 %v1217_v38, %v1216_v39 }
 0x3ba   :  { %1097 = vmatmul.mubr.msk.f32.gmra.mrb[6].mxu0 %vm347_vm2, %v431_v21  ;;  %v1223_v21 = vpack.i.bf16 %v65_v15, %v64_v11 }
 0x3bb   :  { %1099 = vmatprep.mubr.msk.f32.mxu0 %vm347_vm2, %v432_v22  ;;  %1161 = vmatprep.subr.bf16.mxu1 %v1160_v40 }
 0x3bc   :  { %1163 = vmatpush3.bf16.msra.mxu1 %v1160_v40 }
 0x3be   :  { %1100 = vmatmul.mubr.msk.f32.gmra.mrb[8].mxu0 %vm347_vm2, %v433_v23 }
 0x3bf   :  { %1102 = vmatprep.mubr.msk.f32.mxu0 %vm347_vm2, %v434_v25 }
 0x3c2   :  { %1103 = vmatmul.mubr.msk.f32.gmra.mrb[10].mxu0 %vm347_vm2, %v435_v26 }
 0x489   :  { %v1095_v41 = vpop.f32.mrb[4].mxu0 }
 0x48a   :  { %v532_v42 = vpop.f32.mrb[5].mxu0  ;;  %v572_v44 = vmul.f32 %v1095_v41, %v1492_v29  ;;  %v1005_v41 = vld [vmem:[#allocation7 + $0x3] ss:$0 sm:$0xff] }
 0x48b   :  { %v571_v47 = vmul.f32 %v532_v42, %v1476_v18  ;;  %v1001_v18 = vld [vmem:[#allocation7 + $0x1] ss:$0 sm:$0xff] }
 0x48d   :  { %v1098_v43 = vpop.f32.mrb[6].mxu0 }
 0x48e   :  { %v574_v45 = vmul.f32 %v1098_v43, %v1490_v28  ;;  %v542_v46 = vpop.f32.mrb[7].mxu0 }
 0x48f   :  { %v573_v48 = vmul.f32 %v542_v46, %v1494_v30 }
 0x490   :  { %v580_v49 = vadd.f32 %v574_v45, %v572_v44 }
 0x491   :  { %v579_v50 = vadd.f32 %v573_v48, %v571_v47  ;;  %v1101_v51 = vpop.f32.mrb[8].mxu0 }
 0x492   :  { %v576_v53 = vmul.f32 %v1101_v51, %v1496_v31  ;;  %v552_v54 = vpop.f32.mrb[9].mxu0 }
 0x493   :  { %v575_v55 = vmul.f32 %v552_v54, %v1502_v35 }
 0x494   :  { %v582_v56 = vadd.f32 %v580_v49, %v576_v53 }
 0x495   :  { %v581_v57 = vadd.f32 %v579_v50, %v575_v55  ;;  %v1104_v58 = vpop.f32.mrb[10].mxu0  ;;  %v1006_v50 = vld [vmem:[#allocation7 + $0x4] ss:$0 sm:$0xff] }
 0x496   :  { %v578_v29 = vmul.f32 %v1104_v58, %v1508_v37  ;;  %v562_v59 = vpop.f32.mrb[11].mxu0  ;;  %v1009_v58 = vld [vmem:[#allocation7 + $0x5] ss:$0 sm:$0xff] }
 0x497   :  { %v577_v28 = vmul.f32 %v562_v59, %v189_v8 }
 0x498   :  { %v584_v60 = vadd.f32 %v582_v56, %v578_v29 }
 0x499   :  { %v583_v61 = vadd.f32 %v581_v57, %v577_v28 }
 0x49b   :  { %1113 = vmatprep.mubr.msk.f32.mxu1 %vm86_vm0, %v583_v61 }
 0x49c   :  { %1114 = vmatmul.mubr.msk.f32.vlgmr.msra.gmra.mrb[6].mxu1 %vm86_vm0, %v584_v60 }
 0x56f   :  { %v1115_v30 = vpop.f32.mrb[6].mxu1 }
 0x570   :  { %v683_v62 = vadd.f32 %v1115_v30, %v1001_v18  ;;  %v677_v31 = vpop.f32.mrb[7].mxu1 }
 0x571   :  { %v678_v63 = vadd.f32 %v1001_v18, %v677_v31 }
 0x572   :  { %v687_v35 = vadd.f32 %v683_v62, %v1462_v10 }
 0x573   :  { %v686_v19 = vadd.f32 %v678_v63, %v1448_v6  ;;  %v62_v6 = vld [vmem:[#allocation5 + $0x8] sm:$0xff] }
 0x574   :  { %v691_v4 = vsel %vm86_vm0, %v687_v35, 0.0  ;;  %v1164_v14 = vpack.c.bf16 %v63_v13, %v62_v6  ;;  %v1218_v20 = vpack.i.bf16 %v63_v13, %v62_v6  ;;  %v1016_v13 = vld [vmem:[#allocation7 + $0x6] ss:$0 sm:$0xff] }
 0x575   :  { %692 = vadd.xlane.f32.xlu1 %v691_v4  ;;  %v688_v37 = vsel %vm86_vm0, %v686_v19, 0.0 }
 0x576   :  { %689 = vadd.xlane.f32.xlu0 %v688_v37  ;;  %1165 = vmatprep.subr.bf16.mxu0 %v1164_v14 }
 0x577   :  { %1167 = vmatpush3.bf16.msra.mxu0 %v1164_v14 }
 0x578   :  { %1169 = vmatprep.subr.bf16.mxu0 %v1168_v16 }
 0x57b   :  { %1171 = vmatpush3.bf16.msra.mxu0 %v1168_v16  ;;  %v1017_v16 = vld [vmem:[#allocation7 + $0x7] ss:$0 sm:$0xff] }
 0x586   :  { %1219 = vrot.lane.b32.xlu1 %v1218_v20, %s1371_s24 }
 0x602   :  { %v693_v52 = vpop.xlane.xlu1 %692 }
 0x603   :  { %v696_v7 = vmul.f32 0.03125, %v693_v52  ;;  %v690_v0 = vpop.xlane.xlu0 %689 }
 0x604   :  { %v695_v1 = vmul.f32 0.03125, %v690_v0 }
 0x605   :  { %v698_v3 = vsub.f32 %v687_v35, %v696_v7 }
 0x606   :  { %v697_v2 = vsub.f32 %v686_v19, %v695_v1  ;;  %v1220_v26 = vpop.permute.xlu1 %1219 }
 0x607   :  { %v700_v9 = vmul.f32 %v698_v3, %v698_v3  ;;  %v1222_v34 = vunpack.i.h.bf16 %v1220_v26  ;;  %v1221_v36 = vunpack.i.l.bf16 %v1220_v26 }
 0x608   :  { %v699_v5 = vmul.f32 %v697_v2, %v697_v2 }
 0x609   :  { %v704_v10 = vsel %vm86_vm0, %v700_v9, 0.0  ;;  %v1172_v42 = vpack.c.bf16 %v1222_v34, %v1221_v36 }
 0x60a   :  { %v701_v8 = vsel %vm86_vm0, %v699_v5, 0.0 }
 0x60b   :  { %702 = vadd.xlane.f32.xlu0 %v701_v8  ;;  %1174 = vmatprep.subr.msk.bf16.mxu1 %vm1173_vm4, %v1172_v42 }
 0x60c   :  { %1177 = vmatpush3.bf16.xpose.msk.msra.mxu1 %vm1173_vm4, %v1172_v42 }
 0x60f   :  { %705 = vadd.xlane.f32.xlu0 %v704_v10 }
 0x625   :  { %1224 = vrot.lane.b32.xlu0 %v1223_v21, %s1371_s24 }
 0x698   :  { %v703_v17 = vpop.xlane.xlu0 %702 }
 0x699   :  { %v707_v22 = vmul.f32 0.03125, %v703_v17 }
 0x69b   :  { %v709_v12 = vadd.f32 1e-05, %v707_v22 }
 0x69c   :  { %v706_v23 = vpop.xlane.xlu0 %705 }
 0x69d   :  { %1260 = vrsqrt.f32 %v709_v12  ;;  %v708_v24 = vmul.f32 0.03125, %v706_v23 }
 0x69f   :  { %v710_v25 = vadd.f32 1e-05, %v708_v24 }
 0x6a0   :  { %v1225_v27 = vpop.permute.xlu0 %1224 }
 0x6a1   :  { %1262 = vrsqrt.f32 %v710_v25  ;;  %v1227_v38 = vunpack.i.h.bf16 %v1225_v27  ;;  %v1226_v39 = vunpack.i.l.bf16 %v1225_v27 }
 0x6a3   :  { %v1178_v43 = vpack.c.bf16 %v1227_v38, %v1226_v39 }
 0x6a5   :  { %1180 = vmatprep.subr.msk.bf16.mxu1 %vm1173_vm4, %v1178_v43 }
 0x6a6   :  { %1183 = vmatpush3.bf16.xpose.msk.msra.mxu1 %vm1173_vm4, %v1178_v43 }
 0x6a7   :  { %v1261_v32 = vpop.eup %1260 }
 0x6a8   :  { %v713_v40 = vmul.f32 %v1261_v32, %v697_v2 }
 0x6aa   :  { %v719_v44 = vmul.f32 %v1004_v33, %v713_v40 }
 0x6ab   :  { %v1263_v45 = vpop.eup %1262 }
 0x6ac   :  { %v714_v46 = vmul.f32 %v1263_v45, %v698_v3  ;;  %v725_v47 = vadd.f32 %v1005_v41, %v719_v44 }
 0x6ae   :  { %v720_v48 = vmul.f32 %v1004_v33, %v714_v46  ;;  %1124 = vmatprep.mubr.msk.f32.mxu0 %vm86_vm0, %v725_v47 }
 0x6b0   :  { %v726_v49 = vadd.f32 %v1005_v41, %v720_v48 }
 0x6b2   :  { %1125 = vmatmul.mubr.msk.f32.vlgmr.msra.gmra.mrb[12].mxu0 %vm86_vm0, %v726_v49 }
 0x785   :  { %v1126_v51 = vpop.f32.mrb[12].mxu0 }
 0x786   :  { %v809_v53 = vadd.f32 %v1126_v51, %v1006_v50  ;;  %v803_v54 = vpop.f32.mrb[13].mxu0 }
 0x787   :  { %v804_v55 = vadd.f32 %v1006_v50, %v803_v54 }
 0x788   :  { %v813_v57 = vmax.f32 %v809_v53, 0.0 }
 0x789   :  { %v812_v56 = vmax.f32 %v804_v55, 0.0 }
 0x78b   :  { %1135 = vmatprep.mubr.msk.f32.mxu1 %vm830_vm3, %v812_v56 }
 0x78c   :  { %1136 = vmatmul.mubr.msk.f32.vlgmr.msra.gmra.mrb[8].mxu1 %vm830_vm3, %v813_v57 }
 0x85f   :  { %v1137_v29 = vpop.f32.mrb[8].mxu1 }
 0x860   :  { %v917_v59 = vadd.f32 %v1137_v29, %v1009_v58  ;;  %v911_v28 = vpop.f32.mrb[9].mxu1 }
 0x861   :  { %v912_v60 = vadd.f32 %v1009_v58, %v911_v28 }
 0x862   :  { %v921_v61 = vadd.f32 %v917_v59, %v726_v49 }
 0x863   :  { %v920_v18 = vadd.f32 %v912_v60, %v725_v47 }
 0x864   :  { %v925_v30 = vsel %vm86_vm0, %v921_v61, 0.0 }
 0x865   :  { %926 = vadd.xlane.f32.xlu0 %v925_v30  ;;  %v922_v62 = vsel %vm86_vm0, %v920_v18, 0.0 }
 0x866   :  { %923 = vadd.xlane.f32.xlu1 %v922_v62 }
 0x8f2   :  { %v927_v31 = vpop.xlane.xlu0 %926 }
 0x8f3   :  { %v929_v63 = vmul.f32 0.03125, %v927_v31  ;;  %v924_v35 = vpop.xlane.xlu1 %923 }
 0x8f4   :  { %v928_v19 = vmul.f32 0.03125, %v924_v35 }
 0x8f5   :  { %v931_v4 = vsub.f32 %v921_v61, %v929_v63 }
 0x8f6   :  { %v930_v37 = vsub.f32 %v920_v18, %v928_v19 }
 0x8f7   :  { %v933_v52 = vmul.f32 %v931_v4, %v931_v4 }
 0x8f8   :  { %v932_v7 = vmul.f32 %v930_v37, %v930_v37 }
 0x8f9   :  { %v937_v0 = vsel %vm86_vm0, %v933_v52, 0.0 }
 0x8fa   :  { %938 = vadd.xlane.f32.xlu0 %v937_v0  ;;  %v934_v1 = vsel %vm86_vm0, %v932_v7, 0.0 }
 0x8fb   :  { %935 = vadd.xlane.f32.xlu1 %v934_v1 }
 0x987   :  { %v939_v3 = vpop.xlane.xlu0 %938 }
 0x988   :  { %v941_v2 = vmul.f32 0.03125, %v939_v3  ;;  %v936_v5 = vpop.xlane.xlu1 %935 }
 0x989   :  { %v940_v8 = vmul.f32 0.03125, %v936_v5 }
 0x98a   :  { %v943_v9 = vadd.f32 1e-05, %v941_v2 }
 0x98b   :  { %v942_v10 = vadd.f32 1e-05, %v940_v8 }
 0x98c   :  { %1264 = vrsqrt.f32 %v943_v9 }
 0x98d   :  { %1266 = vrsqrt.f32 %v942_v10 }
 0x996   :  { %v1265_v6 = vpop.eup %1264 }
 0x997   :  { %v1267_v14 = vpop.eup %1266  ;;  %v947_v11 = vmul.f32 %v1265_v6, %v931_v4 }
 0x998   :  { %v946_v15 = vmul.f32 %v1267_v14, %v930_v37 }
 0x999   :  { %v953_v20 = vmul.f32 %v1016_v13, %v947_v11 }
 0x99a   :  { %v952_v21 = vmul.f32 %v1016_v13, %v946_v15 }
 0x99b   :  { %v959_v17 = vadd.f32 %v1017_v16, %v953_v20 }
 0x99c   :  { %v958_v22 = vadd.f32 %v1017_v16, %v952_v21 }
 0x99d   :  { %961 = vst.msk [vmem:[#allocation8 + $0x8] sm:$0xff] %vm86_vm0, %v959_v17 }
 0x99e   :  { %960 = vst.msk [vmem:[#allocation8] sm:$0xff] %vm86_vm0, %v958_v22 }
 0x99f   :  { %1345 = shalt.err (!%p1342_p0)
}
 0x9a0   :  { %s1346_s4 = scalar_lea.hbm %s1613_s3, 256 }
 0x9a1   :  { %p1347_p1 = scmp.ne.s32.totalorder %s1613_s3, %s1346_s4  ;;  %p1350_p2 = scmp.lt.u32.totalorder %s1346_s4, %s1613_s3 }
 0x9a3   :  { %p1352_p3 = pnand %p1350_p2, %p1347_p1 }
 0x9a5   :  { %1355 = shalt.err (!%p1352_p3)
}
 0x9a6   :  { %973 = dma.vmem_to_hbm [thread:$0]  %s968_s27, 256, %s1613_s3, [#allocation4], %s1366_s1, %s1366_s1, %s1367_s9  }
 0x9a7   :  { %1360 = dma.done.wait [#allocation4], 256  }
 0x9a8   :  { %1361 = vsyncadd [#allocation4], 4294967040 }
 0x9a9   :  { %977 = vsyncpa [#allocation3], 1 }
 0x9aa   :  { %978 = vsyncpa [#allocation6], 1 }
 0x9ab   :  { %979 = vsyncpa [#allocation4], 1 }

</bundles_post_ra>
